<compile_context>
chip_gen: v7x
topology: tpu7x:2x2x1
jax: 0.10.0
libtpu: 0.0.40
codegen_flags: <defaults>
</compile_context>

<pallas_src>
import functools

import jax
import jax.numpy as jnp
from jax.experimental import pallas as pl
from jax.experimental.pallas import tpu as pltpu


def _round_up(x: int, m: int) -> int:
    return ((x + m - 1) // m) * m


def _vq_eval_kernel(h_ref, cb_ref, idx_ref):
    """One row-tile: normalize h, bf16 MXU similarity matmul against the
    resident pre-normalized bf16 codebook, first-occurrence argmax -> indices.

    The matmul is emitted transposed (codes on sublanes, rows on lanes) so the
    reduction over codes produces a lane-dense [1, row_tile] index vector that
    stores with an unmasked vst.
    """
    h = h_ref[...].astype(jnp.float32)                           # [R, D]

    # F.normalize(p=2, dim=1, eps=1e-6): x / max(||x||, eps)
    #   == x * rsqrt(max(sum(x^2), eps^2)); rsqrt goes to the EUP slot.
    ss = jnp.sum(h * h, axis=1, keepdims=True)
    h_n = (h * jax.lax.rsqrt(jnp.maximum(ss, 1e-12))).astype(jnp.bfloat16)

    # sims^T = codebook_n @ h_n^T: bf16 operands, f32 accumulation (matches
    # the torch.autocast(bf16) matmul).  Shape [K, R].
    sims_t = jax.lax.dot_general(
        cb_ref[...], h_n,
        dimension_numbers=(((1,), (1,)), ((), ())),
        preferred_element_type=jnp.float32)

    k = sims_t.shape[0]
    code = jax.lax.broadcasted_iota(jnp.int32, sims_t.shape, 0)  # [K, R]
    # argmin(2 - 2*sims) == argmax(sims); tie-break = lowest code index,
    # matching torch.argmin's first-occurrence rule.
    max_s = jnp.max(sims_t, axis=0, keepdims=True)               # [1, R]
    idx = jnp.min(jnp.where(sims_t >= max_s, code, k),
                  axis=0, keepdims=True)                         # [1, R] i32
    idx_ref[...] = idx.astype(jnp.int32)


@functools.partial(jax.jit, static_argnames=("row_tile",))
def vq_quantize_eval(h, codebook, *, row_tile=512):
    """Eval-mode VQ quantization (normalize=True path of VQQuantizer).

    h: [B, T, D] or [N, D]; codebook: [K, D].
    Returns (q, c_tilde, c_hard, c_quantized, loss=None, indices) matching the
    PyTorch module's eval forward (q in bf16, the torch-autocast dtype).
    """
    assert row_tile % 8 == 0 and row_tile > 0
    original_shape = h.shape
    is_3d = h.ndim == 3
    h_flat = h.reshape(-1, h.shape[-1])          # native dtype, no copy
    N, D = h_flat.shape
    K, D2 = codebook.shape
    assert D == D2

    # Normalize the codebook ONCE in f32 (torch normalizes in the param dtype,
    # outside the autocast matmul), keep f32 for the exact c_hard gather and a
    # bf16 copy for the in-kernel MXU matmul.
    cb_f32 = codebook.astype(jnp.float32)
    cb_n = cb_f32 * jax.lax.rsqrt(
        jnp.maximum(jnp.sum(cb_f32 * cb_f32, axis=1, keepdims=True), 1e-12))
    cb_bf16 = cb_n.astype(jnp.bfloat16)

    # Row tiling: clamp to N (block never exceeds the array), keep >= 2 grid
    # steps when there is enough work so v7x's two TensorCores both get tiles.
    rt = min(row_tile, N)
    if N > 256 and pl.cdiv(N, rt) < 2:
        rt = _round_up(pl.cdiv(N, 2), 8)
    num_tiles = pl.cdiv(N, rt)

    # Grid-invariant codebook: when it is multiple MiB, a second pipeline
    # buffer only wastes VMEM (matters most inside v7x's 64 MiB per TC).
    single_buffer_cb = (K * D * 2) >= (4 << 20)
    cb_bufs = 1 if single_buffer_cb else 2
    if single_buffer_cb:
        try:
            cb_spec = pl.BlockSpec((K, D), lambda i: (0, 0),
                                   pipeline_mode=pl.Buffered(1))
        except TypeError:  # older pallas without pipeline_mode kwarg
            cb_spec = pl.BlockSpec((K, D), lambda i: (0, 0))
    else:
        cb_spec = pl.BlockSpec((K, D), lambda i: (0, 0))

    # VMEM budget: double-buffered h tiles + resident codebook + idx tiles +
    # the [K, row_tile] f32/i32 intermediates, plus compiler headroom; capped
    # at 75% of the physical per-core VMEM (≈48 MiB v7x, ≈96 MiB v5e/v6e).
    sub = max(_round_up(K, 8), 8)
    lane = max(_round_up(rt, 128), 128)
    needed = (2 * rt * D * h_flat.dtype.itemsize    # h tiles (double-buffered)
              + cb_bufs * K * D * 2                 # bf16 codebook
              + 2 * lane * 4                        # idx output tiles
              + 2 * rt * _round_up(D, 128) * 4      # f32 h / h_n copies
              + 4 * sub * lane * 4)                 # sims_t / iota / mask
    needed += 8 * 1024 * 1024                       # internal scratch headroom
    try:
        vmem_cap = int(pltpu.get_tpu_info().vmem_capacity_bytes)
    except Exception:
        vmem_cap = 64 * 1024 * 1024                 # conservative (v7x per-TC)
    vmem_limit = int(min(max(needed, 32 * 1024 * 1024), (vmem_cap * 3) // 4))

    idx_tiles = pl.pallas_call(
        _vq_eval_kernel,
        out_shape=jax.ShapeDtypeStruct((num_tiles, rt), jnp.int32),
        grid=(num_tiles,),
        in_specs=[
            pl.BlockSpec((rt, D), lambda i: (i, 0)),   # h rows (non-div. edge)
            cb_spec,                                   # resident codebook
        ],
        out_specs=pl.BlockSpec((1, rt), lambda i: (i, 0)),   # lane-dense idx
        compiler_params=pltpu.CompilerParams(
            dimension_semantics=("parallel",),
            vmem_limit_bytes=vmem_limit),
    )(h_flat, cb_bf16)

    indices_flat = idx_tiles.reshape(-1)[:N]        # drop edge-tile tail rows
    # q built outside the kernel (exact one-hot, fuses into consumers); bf16
    # matches the torch-autocast dtype of `distances`/`q`.
    q_flat = jax.nn.one_hot(indices_flat, K, dtype=jnp.bfloat16)
    # Exact f32 gather from the normalized codebook (== torch's
    # `codebook[indices]` in the eval branch, where `codebook` is normalized).
    c_hard_flat = jnp.take(cb_n, indices_flat, axis=0)
    c_tilde_flat = c_hard_flat
    c_quantized_flat = c_hard_flat

    if is_3d:
        B, T = original_shape[0], original_shape[1]
        q = q_flat.reshape(B, T, -1)
        c_tilde = c_tilde_flat.reshape(B, T, -1)
        c_hard = c_hard_flat.reshape(B, T, -1)
        c_quantized = c_quantized_flat.reshape(B, T, -1)
        indices = indices_flat.reshape(B, T)
    else:
        q, c_tilde, c_hard, c_quantized, indices = (
            q_flat, c_tilde_flat, c_hard_flat, c_quantized_flat, indices_flat)
    return q, c_tilde, c_hard, c_quantized, None, indices


def make_codebook(key, num_codes, code_dim):
    # Matches __init__ with normalize=True: randn then row-wise L2 normalize.
    cb = jax.random.normal(key, (num_codes, code_dim), dtype=jnp.float32)
    cb = cb / jnp.maximum(
        jnp.sqrt(jnp.sum(cb * cb, axis=1, keepdims=True)), 1e-12)
    return cb


if __name__ == "__main__":
    B, T, D, K = 2, 8, 32, 16   # batch, seq, code_dim, num_codes
    key = jax.random.PRNGKey(0)
    k_h, k_cb = jax.random.split(key)
    h = jax.random.normal(k_h, (B, T, D), dtype=jnp.float32)
    codebook = make_codebook(k_cb, K, D)

    q, c_tilde, c_hard, c_quantized, loss, indices = vq_quantize_eval(
        h, codebook)
    jax.block_until_ready((q, c_tilde, c_hard, c_quantized, indices))

    # Pure-JAX reference mirroring the autocast-bf16 matmul semantics.
    h_flat = h.reshape(-1, D)
    h_n = h_flat * jax.lax.rsqrt(
        jnp.maximum(jnp.sum(h_flat * h_flat, axis=1, keepdims=True), 1e-12))
    cb_n = codebook * jax.lax.rsqrt(
        jnp.maximum(jnp.sum(codebook * codebook, axis=1, keepdims=True), 1e-12))
    sims_ref = jnp.dot(h_n.astype(jnp.bfloat16),
                       cb_n.astype(jnp.bfloat16).T,
                       preferred_element_type=jnp.float32)

    assert q.shape == (B, T, K) and indices.shape == (B, T)
    assert c_hard.shape == (B, T, D)
    idx_flat = indices.reshape(-1)
    # The kernel's pick must be the most-similar code for every row (allow
    # f32 accumulation-order rounding between MXU and the XLA reference dot).
    picked = jnp.take_along_axis(sims_ref, idx_flat[:, None], axis=1)[:, 0]
    best = jnp.max(sims_ref, axis=1)
    assert bool(jnp.all(picked >= best - 1e-5))
    assert jnp.array_equal(jnp.argmax(q, axis=-1).astype(indices.dtype),
                           indices)
    assert jnp.allclose(jnp.sum(q.astype(jnp.float32), axis=-1), 1.0)
    assert jnp.allclose(c_hard.reshape(-1, D), cb_n[idx_flat], atol=1e-6)
    assert jnp.array_equal(c_tilde, c_hard)
    assert jnp.array_equal(c_quantized, c_hard)
    assert loss is None

    print("KERNEL_OK")
</pallas_src>

<mosaic_0001>
module attributes {stable_mosaic.version = 11 : i64} {
  func.func @_vq_eval_kernel(%arg0: i32, %arg1: memref<16x32xf32, #tpu.memory_space<vmem>>, %arg2: memref<16x32xbf16, #tpu.memory_space<vmem>>, %arg3: memref<1x16xi32, #tpu.memory_space<vmem>>) attributes {dimension_semantics = [#tpu.dimension_semantics<parallel>], iteration_bounds = array<i64: 1>, scalar_prefetch = 0 : i64, scratch_operands = 0 : i64, tpu.core_type = #tpu.core_type<tc>, window_params = [{transform_indices = @transform_0, window_bounds = array<i64: 16, 32>}, {pipeline_mode = #tpu.pipeline_mode<synchronous>, transform_indices = @transform_1, window_bounds = array<i64: 16, 32>}, {transform_indices = @transform_2, window_bounds = array<i64: 1, 16>}]} {
    %c0 = arith.constant 0 : index
    %c0_0 = arith.constant 0 : index
    %0 = vector.load %arg1[%c0, %c0_0] : memref<16x32xf32, #tpu.memory_space<vmem>>, vector<16x32xf32>
    %1 = arith.mulf %0, %0 : vector<16x32xf32>
    %cst = arith.constant dense<0.000000e+00> : vector<16xf32>
    %2 = vector.multi_reduction <add>, %1, %cst [1] : vector<16x32xf32> to vector<16xf32>
    %3 = vector.shape_cast %2 : vector<16xf32> to vector<16x1xf32>
    %cst_1 = arith.constant 9.99999996E-13 : f32
    %4 = vector.broadcast %cst_1 : f32 to vector<16x1xf32>
    %5 = arith.maximumf %3, %4 : vector<16x1xf32>
    %6 = math.rsqrt %5 : vector<16x1xf32>
    %7 = vector.broadcast %6 : vector<16x1xf32> to vector<16x32xf32>
    %8 = arith.mulf %0, %7 : vector<16x32xf32>
    %9 = arith.truncf %8 : vector<16x32xf32> to vector<16x32xbf16>
    %c0_2 = arith.constant 0 : index
    %c0_3 = arith.constant 0 : index
    %10 = vector.load %arg2[%c0_2, %c0_3] : memref<16x32xbf16, #tpu.memory_space<vmem>>, vector<16x32xbf16>
    %cst_4 = arith.constant dense<0.000000e+00> : vector<16x16xf32>
    %11 = tpu.matmul %10, %9, %cst_4 {dimension_numbers = #tpu.dot_dimension_numbers<[1], [1], [0], [0], [0, 0, 1, 0], [], []>} : vector<16x32xbf16>, vector<16x32xbf16>, vector<16x16xf32> -> vector<16x16xf32>
    %12 = tpu.iota {dimensions = array<i32: 0>} : vector<16x16xi32>
    %cst_5 = arith.constant dense<0xFF800000> : vector<16xf32>
    %13 = vector.multi_reduction <maximumf>, %11, %cst_5 [0] : vector<16x16xf32> to vector<16xf32>
    %14 = vector.shape_cast %13 : vector<16xf32> to vector<1x16xf32>
    %15 = vector.broadcast %14 : vector<1x16xf32> to vector<16x16xf32>
    %16 = arith.cmpf oge, %11, %15 : vector<16x16xf32>
    %c16_i32 = arith.constant 16 : i32
    %17 = vector.broadcast %c16_i32 : i32 to vector<16x16xi32>
    %18 = arith.select %16, %12, %17 : vector<16x16xi1>, vector<16x16xi32>
    %cst_6 = arith.constant dense<2147483647> : vector<16xi32>
    %19 = vector.multi_reduction <minsi>, %18, %cst_6 [0] : vector<16x16xi32> to vector<16xi32>
    %20 = vector.shape_cast %19 : vector<16xi32> to vector<1x16xi32>
    %c0_7 = arith.constant 0 : index
    %c0_8 = arith.constant 0 : index
    %21 = vector.load %arg3[%c0_7, %c0_8] : memref<1x16xi32, #tpu.memory_space<vmem>>, vector<1x16xi32>
    tpu.vector_store %arg3[%c0_7, %c0_8], %20 {strides = array<i32>} : memref<1x16xi32, #tpu.memory_space<vmem>>, vector<1x16xi32>,
    return
  }
  func.func @transform_0(%arg0: i32) -> (i32, i32) {
    %c0_i32 = arith.constant 0 : i32
    %c0_i32_0 = arith.constant 0 : i32
    return %arg0, %c0_i32 : i32, i32
  }
  func.func @transform_1(%arg0: i32) -> (i32, i32) {
    %c0_i32 = arith.constant 0 : i32
    %c0_i32_0 = arith.constant 0 : i32
    %c0_i32_1 = arith.constant 0 : i32
    return %c0_i32, %c0_i32_0 : i32, i32
  }
  func.func @transform_2(%arg0: i32) -> (i32, i32) {
    %c0_i32 = arith.constant 0 : i32
    %c0_i32_0 = arith.constant 0 : i32
    return %arg0, %c0_i32 : i32, i32
  }
}

</mosaic_0001>

<bundles_post_ra>
// kernel: vq_quantize_eval.1
= control target key start
LH: loop header
LB: loop body
LE: loop exit
PB: predicated region body
PF: predicated region fallthrough
CT: control target
= control target key end

     0   :  { %vm16_vm0 = vcmask 261120   ;;  %v137_v6 = vmov 0.0   ;;  %vm138_vm1 = vmmov 0   ;;  %vm87_vm2 = vcmask 130048   ;;  %s174_s0 = inlined_call_operand.vmem [shape: f32[16,32], index: 0, kind: input, shape index: {}]   ;;  %s175_s1 = inlined_call_operand.vmem [shape: bf16[16,32], index: 1, kind: input, shape index: {}]   ;;  %s176_s2 = inlined_call_operand.vmem [shape: s32[1,16], index: 2, kind: output, shape index: {}]  }
   0x1   :  { %v12_v0 = vld [vmem:[%s174_s0] sm:$0xff]  ;;  %v13_v1 = vld [vmem:[%s174_s0 + $0x8] sm:$0xff]  ;;  %124 = vmatprep.subr.bf16.mxu0 %v137_v6  ;;  %126 = vmatprep.mubr.msk.bf16.mxu0 %vm138_vm1, %v137_v6  ;;  %v84_v26 = vlaneseq  ;;  %vm114_vm8 = vcmask 122880  }
   0x2   :  { %v14_v2 = vmul.f32 %v12_v0, %v12_v0  ;;  %v15_v3 = vmul.f32 %v13_v1, %v13_v1  ;;  %v132_v17 = vld [vmem:[%s175_s1] sm:$0xff]  }
   0x3   :  { %v85_v29 = vshrl.u32 %v84_v26, 7 }
   0x4   :  { %v17_v4 = vsel %vm16_vm0, %v14_v2, 0.0  ;;  %v20_v5 = vsel %vm16_vm0, %v15_v3, 0.0 }
   0x5   :  { %18 = vadd.xlane.f32.xlu0 %v17_v4  ;;  %v86_v32 = vadd.s32 8, %v85_v29 }
   0x9   :  { %21 = vadd.xlane.f32.xlu0 %v20_v5 }
  0x92   :  { %v19_v7 = vpop.xlane.xlu0 %18 }
  0x93   :  { %v23_v8 = vmax.f32 %v19_v7, 1e-12 }
  0x95   :  { %133 = vrsqrt.f32 %v23_v8 }
  0x96   :  { %v22_v9 = vpop.xlane.xlu0 %21 }
  0x97   :  { %v24_v10 = vmax.f32 %v22_v9, 1e-12 }
  0x99   :  { %135 = vrsqrt.f32 %v24_v10 }
  0x9f   :  { %v134_v11 = vpop.eup %133 }
  0xa0   :  { %v27_v13 = vmul.f32 %v134_v11, %v12_v0 }
  0xa3   :  { %v136_v12 = vpop.eup %135 }
  0xa4   :  { %v28_v14 = vmul.f32 %v136_v12, %v13_v1 }
  0xa6   :  { %v29_v15 = vpack.c.bf16 %v28_v14, %v27_v13 }
  0xa8   :  { %v41_v16 = vsel %vm16_vm0, %v29_v15, 0 }
  0xa9   :  { %125 = vmatpush3.bf16.xpose.msra.mxu0 %v41_v16 }
  0xb0   :  { %127 = vmatmul.mubr.msk.bf16.vlgmr.msra.gmra.mrb[0].mxu0 %vm16_vm0, %v132_v17 }
 0x183   :  { %v77_v18 = vpop.f32.mrb[0].mxu0 }
 0x184   :  { %v128_v19 = vpop.f32.mrb[1].mxu0  ;;  %v88_v21 = vsel %vm87_vm2, %v77_v18, -inf }
 0x185   :  { %v80_v20 = vpop.f32.mrb[2].mxu0 }
 0x186   :  { %v89_v22 = vsel %vm87_vm2, %v80_v20, -inf  ;;  %v129_v23 = vpop.f32.mrb[3].mxu0 }
 0x187   :  { %v90_v24 = vmax.f32 %v88_v21, %v89_v22 }
 0x189   :  { %v91_v25 = vrot.slane %v90_v24, 4 }
 0x18b   :  { %v92_v27 = vmax.f32 %v90_v24, %v91_v25 }
 0x18d   :  { %v93_v28 = vrot.slane %v92_v27, 2 }
 0x18f   :  { %v94_v30 = vmax.f32 %v92_v27, %v93_v28 }
 0x191   :  { %v95_v31 = vrot.slane %v94_v30, 1 }
 0x193   :  { %v96_v33 = vmax.f32 %v94_v30, %v95_v31 }
 0x195   :  { %vm97_vm3 = vcmp.ge.f32.partialorder %v77_v18, %v96_v33  ;;  %vm98_vm4 = vcmp.ge.f32.partialorder %v80_v20, %v96_v33 }
 0x196   :  { %v99_v34 = vsel %vm97_vm3, %v85_v29, 16  ;;  %v100_v35 = vsel %vm98_vm4, %v86_v32, 16 }
 0x197   :  { %v101_v36 = vsel %vm87_vm2, %v99_v34, 2147483647  ;;  %v102_v37 = vsel %vm87_vm2, %v100_v35, 2147483647 }
 0x198   :  { %vm103_vm5 = vcmp.lt.s32.totalorder %v101_v36, %v102_v37 }
 0x199   :  { %v104_v38 = vsel %vm103_vm5, %v101_v36, %v102_v37 }
 0x19a   :  { %v105_v39 = vrot.slane %v104_v38, 4 }
 0x19c   :  { %vm106_vm6 = vcmp.lt.s32.totalorder %v104_v38, %v105_v39 }
 0x19d   :  { %v107_v40 = vsel %vm106_vm6, %v104_v38, %v105_v39 }
 0x19e   :  { %v108_v41 = vrot.slane %v107_v40, 2 }
 0x1a0   :  { %vm109_vm7 = vcmp.lt.s32.totalorder %v107_v40, %v108_v41 }
 0x1a1   :  { %v110_v42 = vsel %vm109_vm7, %v107_v40, %v108_v41 }
 0x1a2   :  { %v111_v43 = vrot.slane %v110_v42, 1 }
 0x1a4   :  { %vm112_vm9 = vcmp.lt.s32.totalorder %v110_v42, %v111_v43 }
 0x1a5   :  { %v113_v44 = vsel %vm112_vm9, %v110_v42, %v111_v43 }
 0x1a6   :  { %115 = vst.msk [vmem:[%s176_s2] sm:$0x1] %vm114_vm8, %v113_v44 }

</bundles_post_ra>
